<compile_context>
chip_gen: v7x
topology: tpu7x:2x2x1
jax: 0.10.0
libtpu: 0.0.40
codegen_flags: <defaults>
</compile_context>

<pallas_src>
import jax
import jax.numpy as jnp
from jax import lax
from jax.experimental import pallas as pl
from jax.experimental.pallas import tpu as pltpu


# --------------------------------------------------------------------------- helpers
def _round_up(x, m):
    return ((x + m - 1) // m) * m


def _vmem_budget_bytes():
    """Usable VMEM budget derived per generation (v5e/v6e 128 MiB, v7x 64 MiB)."""
    cap = 64 * 1024 * 1024  # conservative default (v7x per-TensorCore)
    try:
        info = pltpu.get_tpu_info()
        c = getattr(info, "vmem_capacity_bytes", None)
        if c:
            cap = int(c)
    except Exception:
        pass
    # Leave headroom for compiler-internal scratch; never request more than 96 MiB.
    return min((cap * 3) // 4, 96 * 1024 * 1024)


# --------------------------------------------------------------------------- kernels
def _matmul_kernel_noacc(x_ref, w_ref, o_ref):
    # Weight-resident / single-K-tile case: no reduction grid axis, write directly.
    # (Removes the acc->out VMEM round-trip; relieves the scarce vector-store slot.)
    o_ref[...] = jnp.dot(
        x_ref[...].astype(jnp.bfloat16),
        w_ref[...],
        preferred_element_type=jnp.float32,
    ).astype(o_ref.dtype)


def _matmul_kernel_acc(x_ref, w_ref, o_ref, acc_ref):
    # General case: K is grid axis 2 (last, "arbitrary"); f32 VMEM accumulator.
    @pl.when(pl.program_id(2) == 0)
    def _init():
        acc_ref[...] = jnp.zeros_like(acc_ref)

    acc_ref[...] += jnp.dot(
        x_ref[...].astype(jnp.bfloat16),
        w_ref[...],
        preferred_element_type=jnp.float32,
    )

    @pl.when(pl.program_id(2) == pl.num_programs(2) - 1)
    def _store():
        o_ref[...] = acc_ref[...].astype(o_ref.dtype)


# --------------------------------------------------------------------------- weights
def prepare_embedding_weight(weight):
    """One-time weight prep (do this at init, NOT per forward call).

    weight: (emb_dim, input_dim) float32 in PyTorch nn.Linear layout.
    Returns (w_padded, emb_dim) where w_padded is W.T zero-padded so both dims are
    multiples of 128 (lane-dense output, MXU-aligned K) and cast once to bfloat16.
    """
    emb_dim, input_dim = weight.shape
    kp = _round_up(input_dim, 128)
    np_ = _round_up(emb_dim, 128)
    w_t = weight.T  # (input_dim, emb_dim)
    w_p = jnp.pad(w_t, ((0, kp - input_dim), (0, np_ - emb_dim)))
    return w_p.astype(jnp.bfloat16), emb_dim


def make_orthogonal_weight(key, emb_dim, input_dim):
    """Orthogonal init matching torch.nn.init.orthogonal_ semantics."""
    rows, cols = emb_dim, input_dim
    flat = jax.random.normal(key, (max(rows, cols), min(rows, cols)), dtype=jnp.float32)
    q, r = jnp.linalg.qr(flat)
    d = jnp.sign(jnp.diag(r))
    d = jnp.where(d == 0, 1.0, d)  # robust to exactly-zero R diagonal
    q = q * d[None, :]
    if rows < cols:
        q = q.T
    return q.astype(jnp.float32)  # (emb_dim, input_dim), PyTorch layout


# --------------------------------------------------------------------------- forward
def orthogonal_embedding(x, w_padded, emb_dim):
    """Forward pass: x @ W.T  (== nn.Linear(input_dim, emb_dim, bias=False)(x)).

    x:        (B, input_dim) float32
    w_padded: (Kp, Np) bfloat16, pre-transposed + padded weight from
              prepare_embedding_weight().
    emb_dim:  original embedding dim (output is sliced back to it).
    """
    b, k = x.shape
    kp, np_ = w_padded.shape
    assert kp % 128 == 0 and np_ % 128 == 0 and kp >= k and np_ >= emb_dim

    budget = _vmem_budget_bytes()

    # M tiling: keep the full (8-aligned) M in one block for small batches so the MXU
    # sees one big tile; tile at 256 rows for large batches (2x256x256 MXU on v6e/v7x).
    if b <= 256:
        tm = _round_up(b, 8)
        mp = tm
    else:
        tm = 256
        mp = _round_up(b, 256)

    # Cold path: production callers should pass B % 8 == 0 and input_dim pre-padded to
    # Kp so this extra HBM round-trip over x never runs in the hot loop.
    if mp != b or kp != k:
        x = jnp.pad(x, ((0, mp - b), (0, kp - k)))

    out_dtype = x.dtype
    flops = 2 * mp * kp * np_
    bytes_accessed = 4 * mp * kp + 2 * kp * np_ + 4 * mp * np_
    cost = pl.CostEstimate(flops=flops, transcendentals=0, bytes_accessed=bytes_accessed)

    # ---- Path A: whole bf16 weight resident in VMEM -> single streaming pass over x.
    resident_fp = 2 * (tm * kp * 4 + kp * np_ * 2 + tm * np_ * 4)
    if resident_fp <= budget:
        out_padded = pl.pallas_call(
            _matmul_kernel_noacc,
            out_shape=jax.ShapeDtypeStruct((mp, np_), out_dtype),
            grid_spec=pltpu.PrefetchScalarGridSpec(
                num_scalar_prefetch=0,
                grid=(mp // tm,),
                in_specs=[
                    pl.BlockSpec((tm, kp), lambda i: (i, 0)),
                    pl.BlockSpec((kp, np_), lambda i: (0, 0)),  # invariant -> one fetch
                ],
                out_specs=pl.BlockSpec((tm, np_), lambda i: (i, 0)),
            ),
            compiler_params=pltpu.CompilerParams(
                dimension_semantics=("parallel",),
                vmem_limit_bytes=budget,
            ),
            cost_estimate=cost,
        )(x, w_padded)
        return out_padded[:b, :emb_dim]

    # ---- Path B/C: weight too big for VMEM -> tile N (and K if needed).
    def _fits(tn_, tk_):
        # double-buffered x/w/out tiles + f32 accumulator
        return 2 * (tm * tk_ * 4 + tk_ * tn_ * 2 + tm * tn_ * 4) + tm * tn_ * 4 <= budget

    def _pick(dim, caps, fit):
        for c in caps:
            if dim % c == 0 and fit(c):
                return c
        return 128

    tn = _pick(np_, (1024, 512, 256, 128), lambda c: _fits(c, 128))
    tk = _pick(kp, (2048, 1024, 512, 256, 128), lambda c: _fits(tn, c))
    grid_m, grid_n, grid_k = mp // tm, np_ // tn, kp // tk

    if grid_k == 1:
        # Single K tile (typical for embedding input dims): skip the accumulator.
        out_padded = pl.pallas_call(
            _matmul_kernel_noacc,
            out_shape=jax.ShapeDtypeStruct((mp, np_), out_dtype),
            grid_spec=pltpu.PrefetchScalarGridSpec(
                num_scalar_prefetch=0,
                grid=(grid_m, grid_n),
                in_specs=[
                    pl.BlockSpec((tm, kp), lambda i, j: (i, 0)),
                    pl.BlockSpec((kp, tn), lambda i, j: (0, j)),
                ],
                out_specs=pl.BlockSpec((tm, tn), lambda i, j: (i, j)),
            ),
            compiler_params=pltpu.CompilerParams(
                dimension_semantics=("parallel", "parallel"),
                vmem_limit_bytes=budget,
            ),
            cost_estimate=cost,
        )(x, w_padded)
        return out_padded[:b, :emb_dim]

    # Full reduction path.  On v7x (2 TCs sharing HBM) the core-sharded leading axis
    # should belong to the dominant operand: weight-dominated -> N leads.
    n_leads = kp * np_ * 2 > mp * kp * 4
    if n_leads:
        grid = (grid_n, grid_m, grid_k)
        x_spec = pl.BlockSpec((tm, tk), lambda j, i, kk: (i, kk))
        w_spec = pl.BlockSpec((tk, tn), lambda j, i, kk: (kk, j))
        o_spec = pl.BlockSpec((tm, tn), lambda j, i, kk: (i, j))
    else:
        grid = (grid_m, grid_n, grid_k)
        x_spec = pl.BlockSpec((tm, tk), lambda i, j, kk: (i, kk))
        w_spec = pl.BlockSpec((tk, tn), lambda i, j, kk: (kk, j))
        o_spec = pl.BlockSpec((tm, tn), lambda i, j, kk: (i, j))

    out_padded = pl.pallas_call(
        _matmul_kernel_acc,
        out_shape=jax.ShapeDtypeStruct((mp, np_), out_dtype),
        grid_spec=pltpu.PrefetchScalarGridSpec(
            num_scalar_prefetch=0,
            grid=grid,
            in_specs=[x_spec, w_spec],
            out_specs=o_spec,
            scratch_shapes=[pltpu.VMEM((tm, tn), jnp.float32)],
        ),
        compiler_params=pltpu.CompilerParams(
            dimension_semantics=("parallel", "parallel", "arbitrary"),
            vmem_limit_bytes=budget,
        ),
        cost_estimate=cost,
    )(x, w_padded)
    return out_padded[:b, :emb_dim]


# --------------------------------------------------------------------------- demo
if __name__ == "__main__":
    key = jax.random.PRNGKey(0)
    k_x, k_w = jax.random.split(key)

    batch = 8
    input_dim = 32
    emb_dim = 64

    x = jax.random.normal(k_x, (batch, input_dim), dtype=jnp.float32)
    weight = make_orthogonal_weight(k_w, emb_dim, input_dim)  # (emb_dim, input_dim)

    # One-time weight prep (transpose + lane padding + bf16 cast) -- NOT per call.
    w_padded, emb = prepare_embedding_weight(weight)

    out = orthogonal_embedding(x, w_padded, emb)
    out = jax.block_until_ready(out)

    assert out.shape == (batch, emb_dim)

    # bf16 weights/activations in the MXU with f32 accumulation -> loosened tolerance
    # vs the full-f32 reference.
    ref = jnp.matmul(x, weight.T, precision=lax.Precision.HIGHEST)
    assert jnp.allclose(out, ref, atol=3e-2, rtol=3e-2)

    print("KERNEL_OK")
</pallas_src>

<mosaic_0001>
module attributes {stable_mosaic.version = 11 : i64} {
  func.func @_matmul_kernel_noacc(%arg0: i32, %arg1: memref<8x128xf32, #tpu.memory_space<vmem>>, %arg2: memref<128x128xbf16, #tpu.memory_space<vmem>>, %arg3: memref<8x128xf32, #tpu.memory_space<vmem>>) attributes {dimension_semantics = [#tpu.dimension_semantics<parallel>], iteration_bounds = array<i64: 1>, scalar_prefetch = 0 : i64, scratch_operands = 0 : i64, tpu.core_type = #tpu.core_type<tc>, window_params = [{transform_indices = @transform_0, window_bounds = array<i64: 8, 128>}, {pipeline_mode = #tpu.pipeline_mode<synchronous>, transform_indices = @transform_1, window_bounds = array<i64: 128, 128>}, {transform_indices = @transform_2, window_bounds = array<i64: 8, 128>}]} {
    %c0 = arith.constant 0 : index
    %c0_0 = arith.constant 0 : index
    %0 = vector.load %arg1[%c0, %c0_0] : memref<8x128xf32, #tpu.memory_space<vmem>>, vector<8x128xf32>
    %1 = arith.truncf %0 : vector<8x128xf32> to vector<8x128xbf16>
    %c0_1 = arith.constant 0 : index
    %c0_2 = arith.constant 0 : index
    %2 = vector.load %arg2[%c0_1, %c0_2] : memref<128x128xbf16, #tpu.memory_space<vmem>>, vector<128x128xbf16>
    %cst = arith.constant dense<0.000000e+00> : vector<8x128xf32>
    %3 = tpu.matmul %1, %2, %cst {dimension_numbers = #tpu.dot_dimension_numbers<[1], [0], [0], [1], [0, 0, 1, 1], [], []>} : vector<8x128xbf16>, vector<128x128xbf16>, vector<8x128xf32> -> vector<8x128xf32>
    %c0_3 = arith.constant 0 : index
    %c0_4 = arith.constant 0 : index
    %4 = vector.load %arg3[%c0_3, %c0_4] : memref<8x128xf32, #tpu.memory_space<vmem>>, vector<8x128xf32>
    tpu.vector_store %arg3[%c0_3, %c0_4], %3 {strides = array<i32>} : memref<8x128xf32, #tpu.memory_space<vmem>>, vector<8x128xf32>,
    return
  }
  func.func @transform_0(%arg0: i32) -> (i32, i32) {
    %c0_i32 = arith.constant 0 : i32
    %c0_i32_0 = arith.constant 0 : i32
    return %arg0, %c0_i32 : i32, i32
  }
  func.func @transform_1(%arg0: i32) -> (i32, i32) {
    %c0_i32 = arith.constant 0 : i32
    %c0_i32_0 = arith.constant 0 : i32
    %c0_i32_1 = arith.constant 0 : i32
    return %c0_i32, %c0_i32_0 : i32, i32
  }
  func.func @transform_2(%arg0: i32) -> (i32, i32) {
    %c0_i32 = arith.constant 0 : i32
    %c0_i32_0 = arith.constant 0 : i32
    return %arg0, %c0_i32 : i32, i32
  }
}

</mosaic_0001>

<bundles_post_ra>
// kernel: tpu_custom_call.1
= control target key start
LH: loop header
LB: loop body
LE: loop exit
PB: predicated region body
PF: predicated region fallthrough
CT: control target
= control target key end

     0   :  { %7 = vsyncpa [#allocation3], 0  ;;  %s351_s0 = inlined_call_operand.hbm [shape: f32[8,128], index: 0, kind: input, shape index: {}]   ;;  %s352_s1 = inlined_call_operand.hbm [shape: bf16[128,128], index: 1, kind: input, shape index: {}]   ;;  %s353_s2 = inlined_call_operand.hbm [shape: f32[8,128], index: 2, kind: output, shape index: {}]  }
   0x1   :  { %8 = vsyncpa [#allocation6], 0 }
   0x2   :  { %9 = vsyncpa [#allocation4], 0  ;;  %s286_s9 = smov [#allocation2]   ;;  %s287_s11 = smov [#allocation5]  }
   0x3   :  { %s16_s10 = sshll.u32 %s286_s9, 4  ;;  %s25_s12 = sshll.u32 %s287_s11, 4  ;;  %s17_s10 = int_to_ptr.vmem [resolvable:$true] %s16_s10  ;;  %s308_s12 = int_to_ptr.vmem [resolvable:$true] %s25_s12 }
   0x4   :  { %s214_s15 = scalar_lea.hbm %s351_s0, 128 }
   0x5   :  { %p215_p0 = scmp.ne.s32.totalorder %s351_s0, %s214_s15  ;;  %p218_p1 = scmp.lt.u32.totalorder %s214_s15, %s351_s0 }
   0x7   :  { %p220_p2 = pnand %p218_p1, %p215_p0 }
   0x9   :  { %223 = shalt.err (!%p220_p2)
}
   0xa   :  { %s224_s20 = scalar_lea.vmem %s17_s10, 128  ;;  %p229_p4 = scmp.lt.s32.totalorder %s17_s10, %s17_s10 }
   0xb   :  { %p225_p3 = scmp.ne.s32.totalorder %s17_s10, %s224_s20  ;;  %p230_p5 = scmp.lt.s32.totalorder %s224_s20, %s224_s20 }
   0xd   :  { %p231_p6 = por %p230_p5, %p229_p4 }
   0xf   :  { %p232_p7 = pnand %p231_p6, %p225_p3 }
  0x11   :  { %235 = shalt.err (!%p232_p7)
}
  0x12   :  { %19 = dma.hbm_to_vmem [thread:$0]  %s351_s0, 128, %s17_s10, [#allocation3]  }
  0x13   :  { %s236_s25 = scalar_lea.hbm %s352_s1, 1024 }
  0x14   :  { %p237_p8 = scmp.ne.s32.totalorder %s352_s1, %s236_s25  ;;  %p240_p9 = scmp.lt.u32.totalorder %s236_s25, %s352_s1 }
  0x16   :  { %p242_p10 = pnand %p240_p9, %p237_p8 }
  0x18   :  { %245 = shalt.err (!%p242_p10)
}
  0x19   :  { %s246_s30 = scalar_lea.vmem %s308_s12, 1024  ;;  %p251_p12 = scmp.lt.s32.totalorder %s308_s12, %s308_s12 }
  0x1a   :  { %p247_p11 = scmp.ne.s32.totalorder %s308_s12, %s246_s30  ;;  %p252_p13 = scmp.lt.s32.totalorder %s246_s30, %s246_s30 }
  0x1c   :  { %p253_p0 = por %p252_p13, %p251_p12 }
  0x1e   :  { %p254_p1 = pnand %p253_p0, %p247_p11 }
  0x20   :  { %257 = shalt.err (!%p254_p1)
}
  0x21   :  { %s288_s0 = smov 64   ;;  %s289_s3 = smov 4  }
  0x22   :  { %31 = dma.hbm_to_vmem [thread:$0]  %s352_s1, 1024, %s308_s12, [#allocation6], %s288_s0, %s288_s0, %s289_s3  }
  0x23   :  { %280 = dma.done.wait [#allocation3], 128  }
  0x24   :  { %281 = vsyncadd [#allocation3], 4294967168 }
  0x25   :  { %282 = dma.done.wait [#allocation6], 1024  }
  0x26   :  { %283 = vsyncadd [#allocation6], 4294966272  ;;  %v290_v0 = vmov 0.0   ;;  %vm291_vm0 = vmmov 0   ;;  %v206_v1 = vld [vmem:[#allocation5] sm:$0xff]   ;;  %v207_v2 = vld [vmem:[#allocation5 + $0x8] sm:$0xff]  }
  0x27   :  { %179 = vmatprep.subr.bf16.mxu0 %v290_v0  ;;  %195 = vmatprep.mubr.msk.bf16.mxu0 %vm291_vm0, %v290_v0  ;;  %v208_v3 = vld [vmem:[#allocation5 + $0x10] sm:$0xff]   ;;  %v209_v4 = vld [vmem:[#allocation5 + $0x18] sm:$0xff]   ;;  %v210_v5 = vld [vmem:[#allocation5 + $0x20] sm:$0xff]   ;;  %s292_s1 = smov [#allocation7]  }
  0x28   :  { %180 = vmatpush3.bf16.msra.mxu0 %v206_v1  ;;  %v211_v6 = vld [vmem:[#allocation5 + $0x28] sm:$0xff]   ;;  %v212_v7 = vld [vmem:[#allocation5 + $0x30] sm:$0xff]   ;;  %v213_v8 = vld [vmem:[#allocation5 + $0x38] sm:$0xff]   ;;  %s152_s6 = sshll.u32 %s292_s1, 4  ;;  %s153_s6 = int_to_ptr.vmem [resolvable:$true] %s152_s6 }
  0x29   :  { %181 = vmatprep.subr.bf16.mxu0 %v290_v0  ;;  %v39_v9 = vld [vmem:[#allocation2] sm:$0xff]  ;;  %s258_s7 = scalar_lea.vmem %s153_s6, 128  ;;  %p263_p3 = scmp.lt.s32.totalorder %s153_s6, %s153_s6 }
  0x2a   :  { %v40_v10 = vpack.c.bf16 %v39_v9, %v39_v9  ;;  %p259_p2 = scmp.ne.s32.totalorder %s153_s6, %s258_s7  ;;  %p264_p4 = scmp.lt.s32.totalorder %s258_s7, %s258_s7 }
  0x2c   :  { %182 = vmatpush3.bf16.msra.mxu0 %v207_v2  ;;  %p265_p5 = por %p264_p4, %p263_p3 }
  0x2d   :  { %183 = vmatprep.subr.bf16.mxu0 %v290_v0 }
  0x2e   :  { %p266_p6 = pnand %p265_p5, %p259_p2 }
  0x30   :  { %184 = vmatpush3.bf16.msra.mxu0 %v208_v3 }
  0x31   :  { %185 = vmatprep.subr.bf16.mxu0 %v290_v0 }
  0x34   :  { %186 = vmatpush3.bf16.msra.mxu0 %v209_v4 }
  0x35   :  { %187 = vmatprep.subr.bf16.mxu0 %v290_v0 }
  0x38   :  { %188 = vmatpush3.bf16.msra.mxu0 %v210_v5 }
  0x39   :  { %189 = vmatprep.subr.bf16.mxu0 %v290_v0 }
  0x3c   :  { %190 = vmatpush3.bf16.msra.mxu0 %v211_v6 }
  0x3d   :  { %191 = vmatprep.subr.bf16.mxu0 %v290_v0 }
  0x40   :  { %192 = vmatpush3.bf16.msra.mxu0 %v212_v7 }
  0x41   :  { %193 = vmatprep.subr.bf16.mxu0 %v290_v0 }
  0x44   :  { %194 = vmatpush3.bf16.msra.mxu0 %v213_v8 }
  0x47   :  { %196 = vmatmul.mubr.bf16.vlgmr.msra.gmra.mrb[0].mxu0 %v40_v10 }
 0x11a   :  { %v139_v11 = vpop.f32.mrb[0].mxu0 }
 0x11b   :  { %145 = vst [vmem:[#allocation7] sm:$0xff] %v139_v11  ;;  %v197_v12 = vpop.f32.mrb[1].mxu0 }
 0x11c   :  { %v142_v13 = vpop.f32.mrb[2].mxu0 }
 0x11d   :  { %269 = shalt.err (!%p266_p6)
}
 0x11e   :  { %s270_s10 = scalar_lea.hbm %s353_s2, 128 }
 0x11f   :  { %p271_p7 = scmp.ne.s32.totalorder %s353_s2, %s270_s10  ;;  %p274_p8 = scmp.lt.u32.totalorder %s270_s10, %s353_s2 }
 0x121   :  { %p276_p9 = pnand %p274_p8, %p271_p7 }
 0x123   :  { %279 = shalt.err (!%p276_p9)
}
 0x124   :  { %155 = dma.vmem_to_hbm [thread:$0]  %s153_s6, 128, %s353_s2, [#allocation4]   ;;  %v198_v14 = vpop.f32.mrb[3].mxu0 }
 0x125   :  { %284 = dma.done.wait [#allocation4], 128  }
 0x126   :  { %285 = vsyncadd [#allocation4], 4294967168 }
 0x127   :  { %159 = vsyncpa [#allocation3], 1 }
 0x128   :  { %160 = vsyncpa [#allocation6], 1 }
 0x129   :  { %161 = vsyncpa [#allocation4], 1 }

</bundles_post_ra>
